<compile_context>
chip_gen: v6e
topology: v6e:2x2x1
jax: 0.10.0
libtpu: 0.0.40
codegen_flags: <defaults>
</compile_context>

<pallas_src>
import functools

import jax
import jax.numpy as jnp
from jax import lax
from jax.experimental import pallas as pl
from jax.experimental.pallas import tpu as pltpu

DPAD = 128            # padded input-feature width (lane axis, MXU K)
HPAD = 128            # padded hidden width        (lane axis, MXU N)
MAX_BLOCK_ROWS = 2048  # cap keeps f32 intermediates inside v5e's scoped VMEM


def _round_up(n, m):
    return ((n + m - 1) // m) * m


def _choose_block_rows(b):
    """Pick the batch tile: big (>=256-row multiples), but >=2 tiles for large batches
    so v7x's two TensorCores can split the 'parallel' grid axis."""
    b8 = _round_up(b, 8)
    if b8 <= 256:
        return b8                       # single tile; block dims == full array dims
    half = _round_up((b8 + 1) // 2, 256)
    return min(MAX_BLOCK_ROWS, half)


def _resolve_tiling(b, block_rows):
    if block_rows is None:
        block_rows = _choose_block_rows(b)
    block_rows = _round_up(block_rows, 8)          # f32 sublane multiple
    b_pad = _round_up(b, block_rows)
    if b_pad != block_rows:
        # multi-tile grid: lane-dense output tile width must be a multiple of 128
        block_rows = _round_up(block_rows, 128)
        b_pad = _round_up(b, block_rows)
    return block_rows, b_pad


# ----------------------------------------------------------------------------
# Pallas kernel: fused MLP forward on one batch tile.
#   x_ref    : [Bt, d_in]   f32   raw (state||action) rows (true width, no padding)
#   w_ref    : [256, 128]   bf16  rows 0:128 = W1 (zero-padded), rows 128:256 = W2
#   vec_ref  : [8, 128]     f32   row0=b1, row1=b2, row2=w3 (head weights), row3[0]=b3
#   out_ref  : [1, Bt]      f32   lane-dense critic values for this tile
#   x128_ref : [Bt, 128]    f32   VMEM scratch: zero-extended x
# ----------------------------------------------------------------------------
def sac_critic_kernel(x_ref, w_ref, vec_ref, out_ref, x128_ref, *, d_in):
    # Zero-extend the narrow x tile to 128 lanes entirely inside VMEM (cheap VPU/vst
    # work; avoids any HBM padding traffic and keeps both matmuls fully aligned).
    # Re-zero every step: safe under megacore partitioning of the 'parallel' axis.
    x128_ref[...] = jnp.zeros_like(x128_ref)
    x128_ref[:, 0:d_in] = x_ref[...].astype(jnp.float32)
    xb = x128_ref[...].astype(jnp.bfloat16)          # [Bt, 128] bf16 MXU operand

    w1 = w_ref[0:HPAD, :]                            # [128, 128] bf16
    w2 = w_ref[HPAD:2 * HPAD, :]                     # [128, 128] bf16

    vecs = vec_ref[...]                              # [8, 128] f32
    b1 = vecs[0:1, :]                                # [1, 128]
    b2 = vecs[1:2, :]                                # [1, 128]
    b3 = vecs[3:4, 0:1]                              # [1, 1]

    # Hidden layer 1: bf16 MXU matmul, f32 accumulate + bias + ReLU on the VPU.
    h1 = jnp.dot(xb, w1, preferred_element_type=jnp.float32) + b1
    h1 = jnp.maximum(h1, 0.0)

    # Hidden layer 2.
    h2 = jnp.dot(h1.astype(jnp.bfloat16), w2, preferred_element_type=jnp.float32) + b2
    h2 = jnp.maximum(h2, 0.0)                        # [Bt, 128] f32; padded lanes == 0

    # Head (out_dim = 1), produced lane-dense: contract the f32 vec rows against h2's
    # feature axis (transposed-RHS matmul) -> [8, Bt]; row 2 is w3 . h2.
    head = lax.dot_general(vecs, h2, (((1,), (1,)), ((), ())),
                           preferred_element_type=jnp.float32)   # [8, Bt]
    out_ref[...] = (head[2:3, :] + b3).astype(out_ref.dtype)     # [1, Bt]


# ----------------------------------------------------------------------------
# Parameter init (critic-style uniform, weights stored [in, out]) and packing.
# ----------------------------------------------------------------------------
def init_params(key, input_dim, hidden_dims, out_dim=1):
    dims = [input_dim] + list(hidden_dims) + [out_dim]
    params = []
    for i in range(len(dims) - 1):
        key, wk, bk = jax.random.split(key, 3)
        bound = 1.0 / jnp.sqrt(jnp.float32(dims[i]))
        w = jax.random.uniform(wk, (dims[i], dims[i + 1]), jnp.float32,
                               minval=-bound, maxval=bound)
        b = jax.random.uniform(bk, (1, dims[i + 1]), jnp.float32,
                               minval=-bound, maxval=bound)
        params.extend([w, b])
    return tuple(params)


def pack_params(params):
    """Pack (W1,b1,W2,b2,W3,b3) into a bf16 weight slab + a small f32 vector slab."""
    w1, b1, w2, b2, w3, b3 = params
    h1 = w1.shape[1]
    h2 = w2.shape[1]

    def pad2(a, rows, cols):
        return jnp.pad(a.astype(jnp.float32),
                       ((0, rows - a.shape[0]), (0, cols - a.shape[1])))

    # [256, 128] bf16 slab: W1 on top (input rows zero-padded to 128), W2 below.
    # Zero padding guarantees padded lanes of h1/h2 are exactly zero after bias+ReLU,
    # and that garbage-free contributions from the zero-extended x lanes.
    w_slab = jnp.concatenate([pad2(w1, DPAD, HPAD), pad2(w2, HPAD, HPAD)],
                             axis=0).astype(jnp.bfloat16)

    vec_slab = jnp.zeros((8, HPAD), jnp.float32)
    vec_slab = vec_slab.at[0, :h1].set(b1.reshape(-1))
    vec_slab = vec_slab.at[1, :h2].set(b2.reshape(-1))
    vec_slab = vec_slab.at[2, :h2].set(w3.reshape(-1))    # head weights as a row
    vec_slab = vec_slab.at[3, 0].set(b3.reshape(-1)[0])   # head bias (scalar)
    return w_slab, vec_slab


# ----------------------------------------------------------------------------
# Wrapper: streams x at its true width, grids over batch, lane-dense output.
# ----------------------------------------------------------------------------
@functools.partial(jax.jit, static_argnames=("block_rows",))
def sac_critic_forward(x, w_slab, vec_slab, *, block_rows=None):
    b, d_in = x.shape
    block_rows, b_pad = _resolve_tiling(b, block_rows)

    if b_pad != b:
        # Row padding only (cheap); feature axis keeps its true width.
        x = jnp.pad(x, ((0, b_pad - b), (0, 0)))

    num_tiles = b_pad // block_rows
    flops = 2 * (2 * b_pad * HPAD * HPAD) + 2 * b_pad * HPAD * 8
    bytes_accessed = (b_pad * d_in * x.dtype.itemsize          # x stream
                      + b_pad * 4                              # values out
                      + 2 * HPAD * HPAD * 2 + 8 * HPAD * 4)    # resident weight slabs

    out = pl.pallas_call(
        functools.partial(sac_critic_kernel, d_in=d_in),
        out_shape=jax.ShapeDtypeStruct((1, b_pad), jnp.float32),
        grid_spec=pltpu.PrefetchScalarGridSpec(
            num_scalar_prefetch=0,
            grid=(num_tiles,),
            in_specs=[
                # batch tile at true feature width: streamed / double-buffered
                pl.BlockSpec((block_rows, d_in), lambda i: (i, 0)),
                # weight slabs: constant block index -> fetched once, VMEM-resident
                pl.BlockSpec((2 * HPAD, HPAD), lambda i: (0, 0)),
                pl.BlockSpec((8, HPAD), lambda i: (0, 0)),
            ],
            # lane-dense output row: one (1, block_rows) tile per grid step
            out_specs=pl.BlockSpec((1, block_rows), lambda i: (0, i)),
            scratch_shapes=[pltpu.VMEM((block_rows, DPAD), jnp.float32)],
        ),
        compiler_params=pltpu.CompilerParams(
            # batch tiles are independent -> shard across v7x's two TensorCores
            dimension_semantics=("parallel",),
            # headroom above v5e's 16 MiB scoped default; valid on v6e/v7x too
            vmem_limit_bytes=32 * 1024 * 1024,
        ),
        cost_estimate=pl.CostEstimate(flops=flops, transcendentals=0,
                                      bytes_accessed=bytes_accessed),
    )(x, w_slab, vec_slab)

    return out[0, :b].reshape(b, 1)


# ----------------------------------------------------------------------------
# Pure-JAX references for correctness checks.
# ----------------------------------------------------------------------------
def reference_forward(x, params, mxu_dtype=jnp.float32):
    """f32 math; mxu_dtype=bfloat16 emulates the kernel's MXU operand rounding."""
    w1, b1, w2, b2, w3, b3 = params

    def c(a):
        return a.astype(mxu_dtype).astype(jnp.float32)

    h = jnp.maximum(jnp.dot(c(x), c(w1)) + b1, 0.0)
    h = jnp.maximum(jnp.dot(c(h), c(w2)) + b2, 0.0)
    return jnp.dot(h, w3) + b3


if __name__ == "__main__":
    # Small, module-consistent shapes: state_dim=16, action_dim=4, hidden=[32, 32].
    state_dim = 16
    action_dim = 4
    hidden_dims = [32, 32]
    batch = 8
    input_dim = state_dim + action_dim   # np.prod(state_dim) + np.prod(action_dim)

    key = jax.random.PRNGKey(0)
    key, xk = jax.random.split(key)
    # x is the concatenated (state, action) vector, as SAC_Critic.forward expects.
    x = jax.random.normal(xk, (batch, input_dim), dtype=jnp.float32)

    params = init_params(key, input_dim, hidden_dims, out_dim=1)
    w_slab, vec_slab = pack_params(params)   # pack once, reuse across calls

    value = sac_critic_forward(x, w_slab, vec_slab)
    value = jax.block_until_ready(value)
    assert value.shape == (batch, 1)

    # Tight check vs. a reference with matching bf16 MXU-operand rounding.
    ref_bf16 = reference_forward(x, params, mxu_dtype=jnp.bfloat16)
    assert jnp.allclose(value, ref_bf16, atol=1e-3, rtol=1e-3), "mismatch vs bf16 reference"
    # Loose check vs. the full-f32 reference (deliberately loosened for bf16 matmuls).
    ref_f32 = reference_forward(x, params, mxu_dtype=jnp.float32)
    assert jnp.allclose(value, ref_f32, atol=5e-2, rtol=5e-2), "mismatch vs f32 reference"

    # Exercise the multi-tile path (grid=2, row padding, lane-dense tiled output).
    key, xk2 = jax.random.split(key)
    x2 = jax.random.normal(xk2, (300, input_dim), dtype=jnp.float32)
    value2 = jax.block_until_ready(sac_critic_forward(x2, w_slab, vec_slab))
    ref2 = reference_forward(x2, params, mxu_dtype=jnp.bfloat16)
    assert value2.shape == (300, 1)
    assert jnp.allclose(value2, ref2, atol=1e-3, rtol=1e-3), "multi-tile mismatch"

    print("KERNEL_OK")
</pallas_src>

<mosaic_0001>
module attributes {stable_mosaic.version = 11 : i64} {
  func.func @sac_critic_kernel(%arg0: i32, %arg1: memref<8x20xf32, #tpu.memory_space<vmem>>, %arg2: memref<256x128xbf16, #tpu.memory_space<vmem>>, %arg3: memref<8x128xf32, #tpu.memory_space<vmem>>, %arg4: memref<1x8xf32, #tpu.memory_space<vmem>>, %arg5: memref<8x128xf32, #tpu.memory_space<vmem>>) attributes {dimension_semantics = [#tpu.dimension_semantics<parallel>], iteration_bounds = array<i64: 1>, scalar_prefetch = 0 : i64, scratch_operands = 1 : i64, tpu.core_type = #tpu.core_type<tc>, window_params = [{transform_indices = @transform_0, window_bounds = array<i64: 8, 20>}, {pipeline_mode = #tpu.pipeline_mode<synchronous>, transform_indices = @transform_1, window_bounds = array<i64: 256, 128>}, {pipeline_mode = #tpu.pipeline_mode<synchronous>, transform_indices = @transform_2, window_bounds = array<i64: 8, 128>}, {transform_indices = @transform_3, window_bounds = array<i64: 1, 8>}]} {
    %cst = arith.constant 0.000000e+00 : f32
    %0 = vector.broadcast %cst : f32 to vector<8x128xf32>
    %c0 = arith.constant 0 : index
    %c0_0 = arith.constant 0 : index
    %1 = vector.load %arg5[%c0, %c0_0] : memref<8x128xf32, #tpu.memory_space<vmem>>, vector<8x128xf32>
    tpu.vector_store %arg5[%c0, %c0_0], %0 {strides = array<i32>} : memref<8x128xf32, #tpu.memory_space<vmem>>, vector<8x128xf32>,
    %c0_1 = arith.constant 0 : index
    %c0_2 = arith.constant 0 : index
    %2 = vector.load %arg1[%c0_1, %c0_2] : memref<8x20xf32, #tpu.memory_space<vmem>>, vector<8x20xf32>
    %c0_3 = arith.constant 0 : index
    %c0_4 = arith.constant 0 : index
    %3 = vector.load %arg5[%c0_3, %c0_4] : memref<8x128xf32, #tpu.memory_space<vmem>>, vector<8x20xf32>
    tpu.vector_store %arg5[%c0_3, %c0_4], %2 {strides = array<i32>} : memref<8x128xf32, #tpu.memory_space<vmem>>, vector<8x20xf32>,
    %c0_5 = arith.constant 0 : index
    %c0_6 = arith.constant 0 : index
    %4 = vector.load %arg5[%c0_5, %c0_6] : memref<8x128xf32, #tpu.memory_space<vmem>>, vector<8x128xf32>
    %5 = arith.truncf %4 : vector<8x128xf32> to vector<8x128xbf16>
    %c0_7 = arith.constant 0 : index
    %c0_8 = arith.constant 0 : index
    %6 = vector.load %arg2[%c0_7, %c0_8] : memref<256x128xbf16, #tpu.memory_space<vmem>>, vector<128x128xbf16>
    %c128 = arith.constant 128 : index
    %c0_9 = arith.constant 0 : index
    %7 = vector.load %arg2[%c128, %c0_9] : memref<256x128xbf16, #tpu.memory_space<vmem>>, vector<128x128xbf16>
    %c0_10 = arith.constant 0 : index
    %c0_11 = arith.constant 0 : index
    %8 = vector.load %arg3[%c0_10, %c0_11] : memref<8x128xf32, #tpu.memory_space<vmem>>, vector<8x128xf32>
    %9 = vector.extract_strided_slice %8 {offsets = [0, 0], sizes = [1, 128], strides = [1, 1]} : vector<8x128xf32> to vector<1x128xf32>
    %10 = vector.extract_strided_slice %8 {offsets = [1, 0], sizes = [1, 128], strides = [1, 1]} : vector<8x128xf32> to vector<1x128xf32>
    %11 = vector.extract_strided_slice %8 {offsets = [3, 0], sizes = [1, 1], strides = [1, 1]} : vector<8x128xf32> to vector<1x1xf32>
    %cst_12 = arith.constant dense<0.000000e+00> : vector<8x128xf32>
    %12 = tpu.matmul %5, %6, %cst_12 {dimension_numbers = #tpu.dot_dimension_numbers<[1], [0], [0], [1], [0, 0, 1, 1], [], []>} : vector<8x128xbf16>, vector<128x128xbf16>, vector<8x128xf32> -> vector<8x128xf32>
    %13 = vector.broadcast %9 : vector<1x128xf32> to vector<8x128xf32>
    %14 = arith.addf %12, %13 : vector<8x128xf32>
    %cst_13 = arith.constant 0.000000e+00 : f32
    %15 = vector.broadcast %cst_13 : f32 to vector<8x128xf32>
    %16 = arith.maximumf %14, %15 : vector<8x128xf32>
    %17 = arith.truncf %16 : vector<8x128xf32> to vector<8x128xbf16>
    %cst_14 = arith.constant dense<0.000000e+00> : vector<8x128xf32>
    %18 = tpu.matmul %17, %7, %cst_14 {dimension_numbers = #tpu.dot_dimension_numbers<[1], [0], [0], [1], [0, 0, 1, 1], [], []>} : vector<8x128xbf16>, vector<128x128xbf16>, vector<8x128xf32> -> vector<8x128xf32>
    %19 = vector.broadcast %10 : vector<1x128xf32> to vector<8x128xf32>
    %20 = arith.addf %18, %19 : vector<8x128xf32>
    %cst_15 = arith.constant 0.000000e+00 : f32
    %21 = vector.broadcast %cst_15 : f32 to vector<8x128xf32>
    %22 = arith.maximumf %20, %21 : vector<8x128xf32>
    %cst_16 = arith.constant dense<0.000000e+00> : vector<8x8xf32>
    %23 = tpu.matmul %8, %22, %cst_16 {dimension_numbers = #tpu.dot_dimension_numbers<[1], [1], [0], [0], [0, 0, 1, 0], [], []>} : vector<8x128xf32>, vector<8x128xf32>, vector<8x8xf32> -> vector<8x8xf32>
    %24 = vector.extract_strided_slice %23 {offsets = [2, 0], sizes = [1, 8], strides = [1, 1]} : vector<8x8xf32> to vector<1x8xf32>
    %25 = vector.broadcast %11 : vector<1x1xf32> to vector<1x8xf32>
    %26 = arith.addf %24, %25 : vector<1x8xf32>
    %c0_17 = arith.constant 0 : index
    %c0_18 = arith.constant 0 : index
    %27 = vector.load %arg4[%c0_17, %c0_18] : memref<1x8xf32, #tpu.memory_space<vmem>>, vector<1x8xf32>
    tpu.vector_store %arg4[%c0_17, %c0_18], %26 {strides = array<i32>} : memref<1x8xf32, #tpu.memory_space<vmem>>, vector<1x8xf32>,
    return
  }
  func.func @transform_0(%arg0: i32) -> (i32, i32) {
    %c0_i32 = arith.constant 0 : i32
    %c0_i32_0 = arith.constant 0 : i32
    return %arg0, %c0_i32 : i32, i32
  }
  func.func @transform_1(%arg0: i32) -> (i32, i32) {
    %c0_i32 = arith.constant 0 : i32
    %c0_i32_0 = arith.constant 0 : i32
    %c0_i32_1 = arith.constant 0 : i32
    return %c0_i32, %c0_i32_0 : i32, i32
  }
  func.func @transform_2(%arg0: i32) -> (i32, i32) {
    %c0_i32 = arith.constant 0 : i32
    %c0_i32_0 = arith.constant 0 : i32
    %c0_i32_1 = arith.constant 0 : i32
    return %c0_i32, %c0_i32_0 : i32, i32
  }
  func.func @transform_3(%arg0: i32) -> (i32, i32) {
    %c0_i32 = arith.constant 0 : i32
    %c0_i32_0 = arith.constant 0 : i32
    return %c0_i32, %arg0 : i32, i32
  }
}

</mosaic_0001>

<bundles_post_ra>
// kernel: sac_critic_forward.1
= control target key start
LH: loop header
LB: loop body
LE: loop exit
PB: predicated region body
PF: predicated region fallthrough
CT: control target
= control target key end

     0   :  { %8 = vsyncpa [#allocation4], 0  ;;  %s611_s0 = inlined_call_operand.hbm [shape: f32[8,20], index: 0, kind: input, shape index: {}]   ;;  %s612_s1 = inlined_call_operand.hbm [shape: bf16[256,128], index: 1, kind: input, shape index: {}]   ;;  %s613_s2 = inlined_call_operand.hbm [shape: f32[8,128], index: 2, kind: input, shape index: {}]   ;;  %s614_s3 = inlined_call_operand.hbm [shape: f32[1,8], index: 3, kind: output, shape index: {}]  }
   0x1   :  { %9 = vsyncpa [#allocation7], 0 }
   0x2   :  { %10 = vsyncpa [#allocation5], 0  ;;  %s567_s12 = smov [#allocation6]  }
   0x3   :  { %s26_s13 = sshll.u32 %s567_s12, 4  ;;  %s27_s13 = int_to_ptr.vmem [resolvable:$true] %s26_s13 }
   0x4   :  { %s489_s14 = scalar_lea.vmem %s27_s13, 2048  ;;  %p494_p1 = scmp.lt.s32.totalorder %s27_s13, %s27_s13 }
   0x5   :  { %p490_p0 = scmp.ne.s32.totalorder %s27_s13, %s489_s14  ;;  %p495_p2 = scmp.lt.s32.totalorder %s489_s14, %s489_s14 }
   0x7   :  { %p496_p3 = por %p495_p2, %p494_p1 }
   0x9   :  { %p497_p4 = pnand %p496_p3, %p490_p0 }
   0xb   :  { %500 = shalt.err (!%p497_p4)
}
   0xc   :  { %s568_s15 = smov 64   ;;  %s569_s16 = smov 4  }
   0xd   :  { %32 = dma.hbm_to_vmem [thread:$0]  %s612_s1, 2048, %s27_s13, [#allocation7], %s568_s15, %s568_s15, %s569_s16  }
   0xe   :  { %s570_s19 = smov [#allocation3]   ;;  %s571_s21 = smov [#allocation8]  }
   0xf   :  { %s17_s20 = sshll.u32 %s570_s19, 4  ;;  %s39_s22 = sshll.u32 %s571_s21, 4  ;;  %s18_s20 = int_to_ptr.vmem [resolvable:$true] %s17_s20  ;;  %s40_s22 = int_to_ptr.vmem [resolvable:$true] %s39_s22 }
  0x10   :  { %s509_s23 = scalar_lea.vmem %s18_s20, 128  ;;  %p514_p6 = scmp.lt.s32.totalorder %s18_s20, %s18_s20 }
  0x11   :  { %p510_p5 = scmp.ne.s32.totalorder %s18_s20, %s509_s23  ;;  %p515_p7 = scmp.lt.s32.totalorder %s509_s23, %s509_s23 }
  0x13   :  { %p516_p8 = por %p515_p7, %p514_p6 }
  0x15   :  { %p517_p9 = pnand %p516_p8, %p510_p5 }
  0x17   :  { %520 = shalt.err (!%p517_p9)
}
  0x18   :  { %20 = dma.hbm_to_vmem [thread:$0]  %s611_s0, 128, %s18_s20, [#allocation4]  }
  0x19   :  { %s529_s26 = scalar_lea.vmem %s40_s22, 128  ;;  %p534_p11 = scmp.lt.s32.totalorder %s40_s22, %s40_s22 }
  0x1a   :  { %p530_p10 = scmp.ne.s32.totalorder %s40_s22, %s529_s26  ;;  %p535_p12 = scmp.lt.s32.totalorder %s529_s26, %s529_s26 }
  0x1c   :  { %p536_p13 = por %p535_p12, %p534_p11 }
  0x1e   :  { %p537_p0 = pnand %p536_p13, %p530_p10 }
  0x20   :  { %540 = shalt.err (!%p537_p0)
}
  0x21   :  { %42 = dma.hbm_to_vmem [thread:$0]  %s613_s2, 128, %s40_s22, [#allocation7]  }
  0x22   :  { %561 = dma.done.wait [#allocation4], 128  }
  0x23   :  { %562 = vsyncadd [#allocation4], 4294967168 }
  0x24   :  { %563 = dma.done.wait [#allocation7], 2176  }
  0x25   :  { %564 = vsyncadd [#allocation7], 4294965120  ;;  %v572_v0 = vmov 0.0   ;;  %vm573_vm0 = vmmov 0   ;;  %v465_v1 = vld [vmem:[#allocation6 + $0x38] sm:$0xff]   ;;  %v466_v2 = vld [vmem:[#allocation6 + $0x30] sm:$0xff]   ;;  %v92_v20 = vlaneseq }
  0x26   :  { %410 = vmatprep.subr.bf16.mxu0 %v572_v0  ;;  %53 = vst [vmem:[#allocation2] sm:$0xff] %v572_v0  ;;  %426 = vmatprep.mubr.msk.bf16.mxu0 %vm573_vm0, %v572_v0  ;;  %v467_v3 = vld [vmem:[#allocation6 + $0x28] sm:$0xff]   ;;  %vm55_vm1 = vcmask 162816   ;;  %v54_v4 = vld [vmem:[#allocation3] sm:$0xff]  ;;  %v468_v6 = vld [vmem:[#allocation6 + $0x20] sm:$0xff]   ;;  %v574_v32 = vmov 0  }
  0x27   :  { %430 = vmatprep.subr.bf16.mxu1 %v572_v0  ;;  %446 = vmatprep.mubr.msk.bf16.mxu1 %vm573_vm0, %v572_v0  ;;  %56 = vst.msk [vmem:[#allocation2] sm:$0xff] %vm55_vm1, %v54_v4  ;;  %v473_v5 = vld [vmem:[#allocation6 + $0x78] sm:$0xff]   ;;  %v474_v7 = vld [vmem:[#allocation6 + $0x70] sm:$0xff]   ;;  %v475_v9 = vld [vmem:[#allocation6 + $0x68] sm:$0xff]   ;;  %v93_v21 = vshrl.u32 %v92_v20, 7  ;;  %s575_s0 = smov [#allocation9]  }
  0x28   :  { %411 = vmatpush3.bf16.msra.mxu0 %v465_v1  ;;  %431 = vmatpush3.bf16.msra.mxu1 %v473_v5  ;;  %v469_v8 = vld [vmem:[#allocation6 + $0x18] sm:$0xff]   ;;  %v470_v10 = vld [vmem:[#allocation6 + $0x10] sm:$0xff]   ;;  %v476_v11 = vld [vmem:[#allocation6 + $0x60] sm:$0xff]   ;;  %s364_s2 = sshll.u32 %s575_s0, 4  ;;  %vm356_vm2 = vcmask 59394   ;;  %s365_s2 = int_to_ptr.vmem [resolvable:$true] %s364_s2 }
  0x29   :  { %412 = vmatprep.subr.bf16.mxu0 %v572_v0  ;;  %432 = vmatprep.subr.bf16.mxu1 %v572_v0  ;;  %v471_v12 = vld [vmem:[#allocation6 + $0x8] sm:$0xff]   ;;  %v477_v13 = vld [vmem:[#allocation6 + $0x58] sm:$0xff]   ;;  %v472_v14 = vld [vmem:[#allocation6] sm:$0xff]   ;;  %v94_v22 = vsub.s32 0, %v93_v21  ;;  %v188_v33 = vsub.s32 1, %v93_v21  ;;  %s541_s28 = scalar_lea.vmem %s365_s2, 16  ;;  %p546_p2 = scmp.lt.s32.totalorder %s365_s2, %s365_s2 }
  0x2a   :  { %v478_v16 = vld [vmem:[#allocation6 + $0x50] sm:$0xff]   ;;  %v479_v18 = vld [vmem:[#allocation6 + $0x48] sm:$0xff]   ;;  %v480_v19 = vld [vmem:[#allocation6 + $0x40] sm:$0xff]   ;;  %464 = vset.pattern.permute.xlu0 %v574_v32  ;;  %p542_p1 = scmp.ne.s32.totalorder %s365_s2, %s541_s28  ;;  %s545_s29 = scalar_lea.vmem %s365_s2, 32 }
  0x2b   :  { %v91_v23 = vld [vmem:[#allocation8] sm:$0xff]  ;;  %p547_p3 = scmp.lt.s32.totalorder %s545_s29, %s541_s28 }
  0x2c   :  { %413 = vmatpush3.bf16.msra.mxu0 %v466_v2  ;;  %433 = vmatpush3.bf16.msra.mxu1 %v474_v7  ;;  %v95_v24 = vrot.slane %v91_v23, %v94_v22  ;;  %v189_v34 = vrot.slane %v91_v23, %v188_v33 }
  0x2d   :  { %414 = vmatprep.subr.bf16.mxu0 %v572_v0  ;;  %434 = vmatprep.subr.bf16.mxu1 %v572_v0  ;;  %p548_p4 = por %p547_p3, %p546_p2 }
  0x2e   :  { %v57_v15 = vld [vmem:[#allocation2] sm:$0xff]  ;;  %351 = vperm.xlu0 %464, %v91_v23  }
  0x2f   :  { %v58_v17 = vpack.c.bf16 %v57_v15, %v57_v15  ;;  %p549_p5 = pnand %p548_p4, %p542_p1 }
  0x30   :  { %415 = vmatpush3.bf16.msra.mxu0 %v467_v3  ;;  %435 = vmatpush3.bf16.msra.mxu1 %v475_v9 }
  0x31   :  { %416 = vmatprep.subr.bf16.mxu0 %v572_v0  ;;  %436 = vmatprep.subr.bf16.mxu1 %v572_v0 }
  0x34   :  { %417 = vmatpush3.bf16.msra.mxu0 %v468_v6  ;;  %437 = vmatpush3.bf16.msra.mxu1 %v476_v11 }
  0x35   :  { %418 = vmatprep.subr.bf16.mxu0 %v572_v0  ;;  %438 = vmatprep.subr.bf16.mxu1 %v572_v0 }
  0x38   :  { %419 = vmatpush3.bf16.msra.mxu0 %v469_v8  ;;  %439 = vmatpush3.bf16.msra.mxu1 %v477_v13 }
  0x39   :  { %420 = vmatprep.subr.bf16.mxu0 %v572_v0  ;;  %440 = vmatprep.subr.bf16.mxu1 %v572_v0 }
  0x3c   :  { %421 = vmatpush3.bf16.msra.mxu0 %v470_v10  ;;  %441 = vmatpush3.bf16.msra.mxu1 %v478_v16 }
  0x3d   :  { %422 = vmatprep.subr.bf16.mxu0 %v572_v0  ;;  %442 = vmatprep.subr.bf16.mxu1 %v572_v0 }
  0x40   :  { %423 = vmatpush3.bf16.msra.mxu0 %v471_v12  ;;  %443 = vmatpush3.bf16.msra.mxu1 %v479_v18 }
  0x41   :  { %424 = vmatprep.subr.bf16.mxu0 %v572_v0  ;;  %444 = vmatprep.subr.bf16.mxu1 %v572_v0 }
  0x44   :  { %425 = vmatpush3.bf16.msra.mxu0 %v472_v14  ;;  %445 = vmatpush3.bf16.msra.mxu1 %v480_v19 }
  0x45   :  { %450 = vmatprep.subr.mxu0 %v572_v0 }
  0x47   :  { %427 = vmatmul.mubr.bf16.vlgmr.msra.gmra.mxu0 %v58_v17 }
  0x48   :  { %452 = vmatprep.mubr.msk.f32.mxu0 %vm573_vm0, %v572_v0 }
  0xa9   :  { %v352_v41 = vpop.permute.xlu0 %351 }
  0xaa   :  { %v353_v42 = vrot.slane %v352_v41, 1 }
 0x107   :  { %v178_v25 = vpop.f32.mrf.mxu0 }
 0x108   :  { %v179_v26 = vadd.f32 %v178_v25, %v95_v24 }
 0x109   :  { %v428_v27 = vpop.f32.mrf.mxu0 }
 0x10a   :  { %v184_v28 = vmax.f32 %v179_v26, 0.0 }
 0x10b   :  { %v181_v29 = vpop.f32.mrf.mxu0 }
 0x10c   :  { %v185_v30 = vpack.c.bf16 %v184_v28, %v184_v28 }
 0x10d   :  { %v429_v31 = vpop.f32.mrf.mxu0 }
 0x10e   :  { %447 = vmatmul.mubr.bf16.vlgmr.msra.gmra.mxu1 %v185_v30 }
 0x1ce   :  { %v272_v35 = vpop.f32.mrf.mxu1 }
 0x1cf   :  { %v273_v36 = vadd.f32 %v272_v35, %v189_v34 }
 0x1d0   :  { %v448_v37 = vpop.f32.mrf.mxu1 }
 0x1d1   :  { %v278_v38 = vmax.f32 %v273_v36, 0.0 }
 0x1d2   :  { %v275_v39 = vpop.f32.mrf.mxu1 }
 0x1d3   :  { %451 = vmatpush3.xpose.msra.mxu0 %v278_v38 }
 0x1d4   :  { %v449_v40 = vpop.f32.mrf.mxu1 }
 0x1d6   :  { %453 = vmatmul.mubr.f32.vlgmr.msra.gmra.mxu0 %v91_v23 }
 0x296   :  { %v345_v43 = vpop.f32.mrf.mxu0 }
 0x297   :  { %v355_v44 = vadd.f32 %v353_v42, %v345_v43 }
 0x298   :  { %v454_v45 = vpop.f32.mrf.mxu0 }
 0x299   :  { %357 = vst.msk [vmem:[#allocation9 - $0x2] sm:$0x4] %vm356_vm2, %v355_v44 }
 0x29a   :  { %552 = shalt.err (!%p549_p5)
}
 0x29b   :  { %367 = dma.vmem_to_hbm [thread:$0]  %s365_s2, 16, %s614_s3, [#allocation5]  }
 0x29c   :  { %565 = dma.done.wait [#allocation5], 16  }
 0x29d   :  { %566 = vsyncadd [#allocation5], 4294967280 }
 0x29e   :  { %371 = vsyncpa [#allocation4], 1 }
 0x29f   :  { %372 = vsyncpa [#allocation7], 1 }
 0x2a0   :  { %373 = vsyncpa [#allocation5], 1 }

</bundles_post_ra>
